<compile_context>
chip_gen: v6e
topology: v6e:2x2x1
jax: 0.10.0
libtpu: 0.0.40
codegen_flags: <defaults>
</compile_context>

<pallas_src>
import jax
import jax.numpy as jnp
from jax.experimental import pallas as pl
from jax.experimental.pallas import tpu as pltpu

IN_FEATURES = 20
OUT_FEATURES = 1
_LANE = 128
_VMEM_BUDGET_BYTES = 40 << 20  # for the lane-padded, double-buffered in+out tiles


def _round_up(v, m):
    return -(-v // m) * m


def critic_z_kernel(w_ref, b_ref, x_ref, o_ref):
    """One (tb, 20) row-tile of y = x @ W.T + b.

    w_ref: VMEM (1, IN_FEATURES) f32   -- Linear weight row (constant block)
    b_ref: SMEM (1,) f32               -- Linear bias
    x_ref: VMEM (tb, IN_FEATURES)      -- input rows, native layout/dtype
    o_ref: VMEM (tb, OUT_FEATURES)     -- output rows
    """
    x = x_ref[...].astype(jnp.float32)                    # widen after (possibly bf16) DMA
    acc = jnp.sum(x * w_ref[...], axis=1, keepdims=True)  # VPU multiply + XLU lane reduce
    o_ref[...] = (acc + b_ref[0]).astype(o_ref.dtype)


def critic_z_forward(x, weight, bias, *, tb=16384, min_pallas_batch=1024):
    """CriticZ forward: y = x @ weight.T + bias.

    x: (B, 20) f32/bf16; weight: (1, 20) (PyTorch layout); bias: (1,).
    Returns (B, 1) in x.dtype.
    """
    B, K = x.shape
    assert K == IN_FEATURES and weight.shape == (OUT_FEATURES, IN_FEATURES)

    w32 = weight.astype(jnp.float32)                      # params are tiny; keep f32
    b32 = bias.astype(jnp.float32).reshape(OUT_FEATURES)

    # Tiny batches: the XLA-fused 20-wide row reduction is already at roofline
    # and skips the pallas_call launch / pipeline prologue.
    if B < min_pallas_batch:
        y = jnp.dot(x.astype(jnp.float32), w32.T) + b32
        return y.astype(x.dtype)

    itemsize = x.dtype.itemsize
    # Lane-padded VMEM bytes per row: input (20 -> 128 lanes) + output
    # (1 -> 128 lanes), each double-buffered by the BlockSpec pipeline.
    per_row_vmem = 2 * 2 * _LANE * itemsize

    tb = int(tb)
    tb = min(tb, _VMEM_BUDGET_BYTES // per_row_vmem)      # stay inside scoped VMEM
    tb = min(tb, _round_up(B, 8))                         # never larger than the batch
    if B > 2048:
        # Keep >= 2 grid steps so both v7x TensorCores get work.
        tb = min(tb, max(1024, _round_up((B + 1) // 2, 8)))
    tb = max(8, _round_up(tb, 8))

    grid = (pl.cdiv(B, tb),)
    vmem_limit = min(max(per_row_vmem * tb + (8 << 20), 16 << 20), 56 << 20)

    return pl.pallas_call(
        critic_z_kernel,
        out_shape=jax.ShapeDtypeStruct((B, OUT_FEATURES), x.dtype),
        grid_spec=pltpu.PrefetchScalarGridSpec(
            num_scalar_prefetch=0,
            grid=grid,
            in_specs=[
                # Weight row stays VMEM-resident (constant block index).
                pl.BlockSpec((OUT_FEATURES, IN_FEATURES), lambda i: (0, 0)),
                # Bias is a single SMEM scalar.
                pl.BlockSpec(memory_space=pltpu.MemorySpace.SMEM),
                # x tile: contiguous (tb, 20) HBM slab -- no transpose, no pad copy.
                pl.BlockSpec((tb, IN_FEATURES), lambda i: (i, 0)),
            ],
            out_specs=pl.BlockSpec((tb, OUT_FEATURES), lambda i: (i, 0)),
        ),
        compiler_params=pltpu.CompilerParams(
            dimension_semantics=("parallel",),
            vmem_limit_bytes=vmem_limit,
        ),
    )(w32, b32, x)


if __name__ == "__main__":
    key = jax.random.PRNGKey(0)
    kx, kw, kb, kx2 = jax.random.split(key, 4)

    # Deterministic "parameters" (same shapes as nn.Linear(20, 1)).
    bound = 1.0 / (IN_FEATURES ** 0.5)
    weight = jax.random.uniform(kw, (OUT_FEATURES, IN_FEATURES),
                                dtype=jnp.float32, minval=-bound, maxval=bound)
    bias = jax.random.uniform(kb, (OUT_FEATURES,),
                              dtype=jnp.float32, minval=-bound, maxval=bound)

    # 1) Small batch forced through the Pallas path (tb clamps to 8, grid=(1,)).
    x_small = jax.random.normal(kx, (8, IN_FEATURES), dtype=jnp.float32)
    y_small = jax.block_until_ready(
        critic_z_forward(x_small, weight, bias, min_pallas_batch=0))
    ref_small = x_small @ weight.T + bias
    assert y_small.shape == (8, OUT_FEATURES)
    assert jnp.allclose(y_small, ref_small, atol=1e-5, rtol=1e-5)

    # 2) Ragged batch: B=1000, tb=256 -> grid=(4,) with a masked last block
    #    (no wrapper-side pad/transpose copies of x).
    x_big = jax.random.normal(kx2, (1000, IN_FEATURES), dtype=jnp.float32)
    y_big = jax.block_until_ready(
        critic_z_forward(x_big, weight, bias, tb=256, min_pallas_batch=0))
    ref_big = x_big @ weight.T + bias
    assert y_big.shape == (1000, OUT_FEATURES)
    assert jnp.allclose(y_big, ref_big, atol=1e-5, rtol=1e-5)

    # 3) bf16 activations stay bf16 on the HBM wire (half the read traffic);
    #    accumulation stays f32 in-kernel.
    x_bf = x_big.astype(jnp.bfloat16)
    y_bf = jax.block_until_ready(
        critic_z_forward(x_bf, weight, bias, tb=256, min_pallas_batch=0))
    ref_bf = x_bf.astype(jnp.float32) @ weight.T + bias
    assert y_bf.dtype == jnp.bfloat16
    assert jnp.allclose(y_bf.astype(jnp.float32), ref_bf, atol=3e-2, rtol=3e-2)

    # 4) Default heuristic: tiny batches use the fused-XLA fallback.
    y_fb = jax.block_until_ready(critic_z_forward(x_small, weight, bias))
    assert jnp.allclose(y_fb, ref_small, atol=1e-5, rtol=1e-5)

    print("KERNEL_OK")
</pallas_src>

<mosaic_0001>
module attributes {stable_mosaic.version = 11 : i64} {
  func.func @critic_z_kernel(%arg0: i32, %arg1: memref<1x20xf32, #tpu.memory_space<vmem>>, %arg2: memref<1xf32, #tpu.memory_space<smem>>, %arg3: memref<8x20xf32, #tpu.memory_space<vmem>>, %arg4: memref<8x1xf32, #tpu.memory_space<vmem>>) attributes {dimension_semantics = [#tpu.dimension_semantics<parallel>], iteration_bounds = array<i64: 1>, scalar_prefetch = 0 : i64, scratch_operands = 0 : i64, tpu.core_type = #tpu.core_type<tc>, window_params = [{pipeline_mode = #tpu.pipeline_mode<synchronous>, transform_indices = @transform_0, window_bounds = array<i64: 1, 20>}, {transform_indices = @transform_1, window_bounds = array<i64: 1>}, {transform_indices = @transform_2, window_bounds = array<i64: 8, 20>}, {transform_indices = @transform_3, window_bounds = array<i64: 8, 1>}]} {
    %c0 = arith.constant 0 : index
    %c0_0 = arith.constant 0 : index
    %0 = vector.load %arg3[%c0, %c0_0] : memref<8x20xf32, #tpu.memory_space<vmem>>, vector<8x20xf32>
    %c0_1 = arith.constant 0 : index
    %c0_2 = arith.constant 0 : index
    %1 = vector.load %arg1[%c0_1, %c0_2] : memref<1x20xf32, #tpu.memory_space<vmem>>, vector<1x20xf32>
    %2 = vector.broadcast %1 : vector<1x20xf32> to vector<8x20xf32>
    %3 = arith.mulf %0, %2 : vector<8x20xf32>
    %cst = arith.constant dense<0.000000e+00> : vector<8xf32>
    %4 = vector.multi_reduction <add>, %3, %cst [1] : vector<8x20xf32> to vector<8xf32>
    %5 = vector.shape_cast %4 : vector<8xf32> to vector<8x1xf32>
    %c0_3 = arith.constant 0 : index
    %6 = memref.load %arg2[%c0_3] : memref<1xf32, #tpu.memory_space<smem>>
    %7 = vector.broadcast %6 : f32 to vector<8x1xf32>
    %8 = arith.addf %5, %7 : vector<8x1xf32>
    %c0_4 = arith.constant 0 : index
    %c0_5 = arith.constant 0 : index
    %9 = vector.load %arg4[%c0_4, %c0_5] : memref<8x1xf32, #tpu.memory_space<vmem>>, vector<8x1xf32>
    tpu.vector_store %arg4[%c0_4, %c0_5], %8 {strides = array<i32>} : memref<8x1xf32, #tpu.memory_space<vmem>>, vector<8x1xf32>,
    return
  }
  func.func @transform_0(%arg0: i32) -> (i32, i32) {
    %c0_i32 = arith.constant 0 : i32
    %c0_i32_0 = arith.constant 0 : i32
    %c0_i32_1 = arith.constant 0 : i32
    return %c0_i32, %c0_i32_0 : i32, i32
  }
  func.func @transform_1(%arg0: i32) -> i32 {
    %c0_i32 = arith.constant 0 : i32
    %c0_i32_0 = arith.constant 0 : i32
    return %c0_i32 : i32
  }
  func.func @transform_2(%arg0: i32) -> (i32, i32) {
    %c0_i32 = arith.constant 0 : i32
    %c0_i32_0 = arith.constant 0 : i32
    return %arg0, %c0_i32 : i32, i32
  }
  func.func @transform_3(%arg0: i32) -> (i32, i32) {
    %c0_i32 = arith.constant 0 : i32
    %c0_i32_0 = arith.constant 0 : i32
    return %arg0, %c0_i32 : i32, i32
  }
}

</mosaic_0001>

<bundles_post_ra>
// kernel: tpu_custom_call.1
= control target key start
LH: loop header
LB: loop body
LE: loop exit
PB: predicated region body
PF: predicated region fallthrough
CT: control target
= control target key end

     0   :  { %9 = vsyncpa [#allocation4], 0  ;;  %s74_s12 = smov [#allocation3]   ;;  %s107_s0 = inlined_call_operand.vmem [shape: f32[1,20], index: 0, kind: input, shape index: {}]   ;;  %s108_s1 = inlined_call_operand.<no memory space> [shape: f32[1], index: 1, kind: input, shape index: {}]   ;;  %s109_s2 = inlined_call_operand.hbm [shape: f32[8,20], index: 2, kind: input, shape index: {}]   ;;  %s110_s3 = inlined_call_operand.vmem [shape: f32[8,1], index: 3, kind: output, shape index: {}]  }
   0x1   :  { %s20_s13 = sshll.u32 %s74_s12, 4  ;;  %s21_s13 = int_to_ptr.vmem [resolvable:$true] %s20_s13 }
   0x2   :  { %s60_s14 = scalar_lea.vmem %s21_s13, 128  ;;  %p65_p1 = scmp.lt.s32.totalorder %s21_s13, %s21_s13 }
   0x3   :  { %p61_p0 = scmp.ne.s32.totalorder %s21_s13, %s60_s14  ;;  %p66_p2 = scmp.lt.s32.totalorder %s60_s14, %s60_s14 }
   0x5   :  { %p67_p3 = por %p66_p2, %p65_p1 }
   0x7   :  { %p68_p4 = pnand %p67_p3, %p61_p0 }
   0x9   :  { %71 = shalt.err (!%p68_p4)
}
   0xa   :  { %23 = dma.hbm_to_vmem [thread:$0]  %s109_s2, 128, %s21_s13, [#allocation4]  }
   0xb   :  { %72 = dma.done.wait [#allocation4], 128  }
   0xc   :  { %73 = vsyncadd [#allocation4], 4294967168  ;;  %v27_v0 = vld [vmem:[#allocation3] sm:$0xff]  ;;  %vm36_vm0 = vcmask 162816   ;;  %v41_v4 = vstv %s108_s1  ;;  %vm43_vm1 = vcmask 7168  }
   0xd   :  { %v50_v1 = vld [vmem:[%s107_s0] ss:$0 sm:$0xff] }
   0xe   :  { %v35_v2 = vmul.f32 %v50_v1, %v27_v0 }
  0x10   :  { %v37_v3 = vsel %vm36_vm0, %v35_v2, 0.0 }
  0x11   :  { %38 = vadd.xlane.f32.xlu0 %v37_v3 }
  0x9a   :  { %v39_v5 = vpop.xlane.xlu0 %38 }
  0x9b   :  { %v42_v6 = vadd.f32 %v41_v4, %v39_v5 }
  0x9d   :  { %44 = vst.msk [vmem:[%s110_s3] sm:$0xff] %vm43_vm1, %v42_v6 }
  0x9e   :  { %49 = vsyncpa [#allocation4], 1 }

</bundles_post_ra>
